<compile_context>
chip_gen: v7x
topology: tpu7x:2x2x1
jax: 0.10.0
libtpu: 0.0.40
codegen_flags: <defaults>
</compile_context>

<pallas_src>
import functools

import jax
import jax.numpy as jnp
from jax import lax
from jax.experimental import pallas as pl
from jax.experimental.pallas import tpu as pltpu


def _psm_basic_block_kernel(x_ref, w1_ref, b1_ref, w2_ref, b2_ref, o_ref, *, H):
    """One grid step processes Nb images flattened into an (M=Nb*H, W*C) slab.

    x_ref : (M, W*Cin)        f32, lane-dense (also the residual source)
    w1_ref: (W*Cin, 3*W*Cout) bf16 banded conv1 weights (BN1 scale folded),
                              the 3 ky taps stacked along the output dim
    b1_ref: (1, W*Cout)       f32 folded BN1 bias (tiled over W)
    w2_ref: (W*Cout, 3*W*Cout) bf16 banded conv2 weights (BN2 scale folded)
    b2_ref: (1, W*Cout)       f32 folded BN2 bias
    o_ref : (M, W*Cout)
    """
    M, _ = x_ref.shape
    WCout = b1_ref.shape[1]

    x = x_ref[...].astype(jnp.float32)                      # (M, W*Cin)

    # Image-boundary masks: the ky=0 / ky=2 taps are combined with sublane
    # rolls of the whole flattened slab; rolled rows that wrap across an image
    # boundary (first/last row of every H-row image) must be zeroed.
    row = lax.broadcasted_iota(jnp.int32, (M, 1), 0)
    top_mask = (row % H != 0).astype(jnp.float32)           # kills wrapped ky=0
    bot_mask = (row % H != H - 1).astype(jnp.float32)       # kills wrapped ky=2

    def conv3x3_bn(act, w_ref, b_ref):
        # One MXU matmul per conv: K = W*Cin, N = 3*W*Cout (all three ky taps).
        taps = jnp.dot(act.astype(jnp.bfloat16), w_ref[...],
                       preferred_element_type=jnp.float32)   # (M, 3*WCout) f32
        t0 = taps[:, :WCout]                  # contribution of input row h-1
        t1 = taps[:, WCout:2 * WCout]         # contribution of input row h
        t2 = taps[:, 2 * WCout:]              # contribution of input row h+1
        y = (top_mask * pltpu.roll(t0, 1, axis=0)            # t0[h-1] -> row h
             + t1
             + bot_mask * pltpu.roll(t2, M - 1, axis=0))     # t2[h+1] -> row h
        return y + b_ref[...]

    h1 = jnp.maximum(conv3x3_bn(x, w1_ref, b1_ref), 0.0)     # conv1 + BN1 + ReLU
    h2 = conv3x3_bn(h1, w2_ref, b2_ref)                      # conv2 + BN2
    o_ref[...] = (h2 + x).astype(o_ref.dtype)                # identity shortcut


def _band_weights(w_hwio, scale, W):
    """Fold the BN scale into the conv weights and build a single
    (W*Cin, 3*W*Cout) block-banded matrix: the 3 ky taps concatenated along the
    output dim, each tap folding the kx shifts + zero padding of 1 in W."""
    wf = (w_hwio * scale[None, None, None, :]).astype(jnp.float32)  # (3,3,Ci,Co)
    bands = []
    for ky in range(3):
        blocks = [jnp.kron(jnp.eye(W, k=1 - kx, dtype=jnp.float32), wf[ky, kx])
                  for kx in range(3)]
        bands.append(blocks[0] + blocks[1] + blocks[2])      # (W*Cin, W*Cout)
    return jnp.concatenate(bands, axis=1)                    # (W*Cin, 3*W*Cout)


def prepare_psm_params(w1_hwio, s1, b1, w2_hwio, s2, b2, W):
    """Parameter-load-time work (hoisted out of the per-forward path)."""
    w1b = _band_weights(w1_hwio, s1, W).astype(jnp.bfloat16)  # bf16 MXU operands
    w2b = _band_weights(w2_hwio, s2, W).astype(jnp.bfloat16)
    b1t = jnp.tile(b1, W).reshape(1, -1).astype(jnp.float32)
    b2t = jnp.tile(b2, W).reshape(1, -1).astype(jnp.float32)
    return w1b, b1t, w2b, b2t


@jax.jit
def psm_basic_block(x_nhwc, w1b, b1t, w2b, b2t):
    """x_nhwc: (N, H, W, C) float32. Returns (N, H, W, C)."""
    N, H, W, Cin = x_nhwc.shape
    WCin = W * Cin
    WCout = b1t.shape[1]
    Cout = WCout // W

    # Only the exercised PSMBasicBlock config is implemented:
    # stride=1, pad=1, dilation=1, downsample=None (identity shortcut).
    assert Cin == Cout, "identity shortcut requires inplanes == planes"
    assert w1b.shape == (WCin, 3 * WCout) and w2b.shape == (WCout, 3 * WCout)
    assert WCin % 128 == 0 and WCout % 128 == 0, "lane-dense W*C required"

    # Images per grid step: fatten the MXU M dim to >= 128 rows, but keep at
    # least 2 grid steps when the batch allows so both v7x TensorCores get work.
    Nb = min(N, max(1, 128 // H))
    if N // Nb < 2 and N >= 2:
        Nb = N // 2
    while N % Nb:
        Nb -= 1
    M = Nb * H
    assert M % 8 == 0

    x2d = x_nhwc.reshape(N * H, WCin)          # free row-major reshape

    out2d = pl.pallas_call(
        functools.partial(_psm_basic_block_kernel, H=H),
        out_shape=jax.ShapeDtypeStruct((N * H, WCout), x_nhwc.dtype),
        grid_spec=pltpu.PrefetchScalarGridSpec(
            num_scalar_prefetch=0,
            grid=(N // Nb,),
            in_specs=[
                pl.BlockSpec((M, WCin), lambda n: (n, 0)),
                # TODO(synk): at production band sizes, single-buffer these
                # grid-invariant operands (pipeline_mode=pl.Buffered(1)).
                pl.BlockSpec((WCin, 3 * WCout), lambda n: (0, 0)),
                pl.BlockSpec((1, WCout), lambda n: (0, 0)),
                pl.BlockSpec((WCout, 3 * WCout), lambda n: (0, 0)),
                pl.BlockSpec((1, WCout), lambda n: (0, 0)),
            ],
            out_specs=pl.BlockSpec((M, WCout), lambda n: (n, 0)),
        ),
        compiler_params=pltpu.CompilerParams(
            dimension_semantics=("parallel",)),               # image slabs indep.
    )(x2d, w1b, b1t, w2b, b2t)

    return out2d.reshape(N, H, W, Cout)


def _fold_bn(gamma, beta, mean, var, eps=1e-5):
    scale = gamma / jnp.sqrt(var + eps)
    bias = beta - mean * scale
    return scale, bias


def _reference(x_nhwc, w1_hwio, s1, b1, w2_hwio, s2, b2):
    """Pure-JAX f32 reference of the same block (NHWC)."""
    dn = ("NHWC", "HWIO", "NHWC")
    y = lax.conv_general_dilated(x_nhwc, w1_hwio, (1, 1), ((1, 1), (1, 1)),
                                 dimension_numbers=dn,
                                 precision=lax.Precision.HIGHEST)
    y = jnp.maximum(y * s1.reshape(1, 1, 1, -1) + b1.reshape(1, 1, 1, -1), 0.0)
    z = lax.conv_general_dilated(y, w2_hwio, (1, 1), ((1, 1), (1, 1)),
                                 dimension_numbers=dn,
                                 precision=lax.Precision.HIGHEST)
    z = z * s2.reshape(1, 1, 1, -1) + b2.reshape(1, 1, 1, -1)
    return z + x_nhwc


if __name__ == "__main__":
    # W * C = 128 -> fully lane-dense last dim for all kernel tensors.
    # Batch 16 -> each grid step runs an M = 8*16 = 128 slab and the grid keeps
    # 2 "parallel" steps (both TensorCores busy on v7x).
    N, C, H, W = 16, 8, 16, 16    # inplanes == planes == C (identity shortcut)
    key = jax.random.PRNGKey(0)
    kx_, kw1, kw2 = jax.random.split(key, 3)

    # input in PyTorch NCHW convention
    x_nchw = jax.random.normal(kx_, (N, C, H, W), jnp.float32)
    x_nhwc = jnp.transpose(x_nchw, (0, 2, 3, 1))

    # conv weights, generated in PyTorch OIHW layout, converted to HWIO
    w1_oihw = jax.random.normal(kw1, (C, C, 3, 3), jnp.float32) * 0.1
    w2_oihw = jax.random.normal(kw2, (C, C, 3, 3), jnp.float32) * 0.1
    w1_hwio = jnp.transpose(w1_oihw, (2, 3, 1, 0))           # (3,3,Cin,Cout)
    w2_hwio = jnp.transpose(w2_oihw, (2, 3, 1, 0))

    # deterministic BatchNorm parameters / running stats (eval mode), folded
    idx = jnp.arange(C, dtype=jnp.float32)
    s1, b1 = _fold_bn(1.0 + 0.10 * idx, 0.05 * idx, 0.01 * idx, 1.0 + 0.02 * idx)
    s2, b2 = _fold_bn(1.0 - 0.05 * idx, -0.03 * idx, -0.02 * idx, 1.0 + 0.01 * idx)

    # Banded weights / biases built once at parameter-load time.
    params = prepare_psm_params(w1_hwio, s1, b1, w2_hwio, s2, b2, W)
    w1b, b1t, w2b, b2t = jax.block_until_ready(params)

    out_nhwc = psm_basic_block(x_nhwc, w1b, b1t, w2b, b2t)
    out_nhwc = jax.block_until_ready(out_nhwc)
    out_nchw = jnp.transpose(out_nhwc, (0, 3, 1, 2))          # back to NCHW

    ref_nhwc = _reference(x_nhwc, w1_hwio, s1, b1, w2_hwio, s2, b2)
    assert out_nchw.shape == (N, C, H, W)
    # bf16 MXU operands (f32 accumulation) -> loosened tolerance vs f32 ref.
    assert jnp.allclose(out_nhwc, ref_nhwc, rtol=5e-2, atol=5e-2), \
        "Pallas kernel does not match JAX reference"

    print("KERNEL_OK")
</pallas_src>

<mosaic_0001>
module attributes {stable_mosaic.version = 11 : i64} {
  func.func @_psm_basic_block_kernel(%arg0: i32, %arg1: memref<128x128xf32, #tpu.memory_space<vmem>>, %arg2: memref<128x384xbf16, #tpu.memory_space<vmem>>, %arg3: memref<1x128xf32, #tpu.memory_space<vmem>>, %arg4: memref<128x384xbf16, #tpu.memory_space<vmem>>, %arg5: memref<1x128xf32, #tpu.memory_space<vmem>>, %arg6: memref<128x128xf32, #tpu.memory_space<vmem>>) attributes {dimension_semantics = [#tpu.dimension_semantics<parallel>], iteration_bounds = array<i64: 2>, scalar_prefetch = 0 : i64, scratch_operands = 0 : i64, tpu.core_type = #tpu.core_type<tc>, window_params = [{transform_indices = @transform_0, window_bounds = array<i64: 128, 128>}, {pipeline_mode = #tpu.pipeline_mode<synchronous>, transform_indices = @transform_1, window_bounds = array<i64: 128, 384>}, {pipeline_mode = #tpu.pipeline_mode<synchronous>, transform_indices = @transform_2, window_bounds = array<i64: 1, 128>}, {pipeline_mode = #tpu.pipeline_mode<synchronous>, transform_indices = @transform_3, window_bounds = array<i64: 128, 384>}, {pipeline_mode = #tpu.pipeline_mode<synchronous>, transform_indices = @transform_4, window_bounds = array<i64: 1, 128>}, {transform_indices = @transform_5, window_bounds = array<i64: 128, 128>}]} {
    %c0 = arith.constant 0 : index
    %c0_0 = arith.constant 0 : index
    %0 = vector.load %arg1[%c0, %c0_0] : memref<128x128xf32, #tpu.memory_space<vmem>>, vector<128x128xf32>
    %1 = tpu.iota {dimensions = array<i32: 0>} : vector<128x1xi32>
    %c16_i32 = arith.constant 16 : i32
    %c0_i32 = arith.constant 0 : i32
    %2 = arith.cmpi eq, %c16_i32, %c0_i32 : i32
    %c1_i32 = arith.constant 1 : i32
    %3 = arith.select %2, %c1_i32, %c16_i32 : i32
    %4 = vector.broadcast %3 : i32 to vector<128x1xi32>
    %5 = arith.remsi %1, %4 : vector<128x1xi32>
    %c0_i32_1 = arith.constant 0 : i32
    %6 = vector.broadcast %c0_i32_1 : i32 to vector<128x1xi32>
    %7 = arith.cmpi ne, %5, %6 : vector<128x1xi32>
    %c0_i32_2 = arith.constant 0 : i32
    %8 = vector.broadcast %c0_i32_2 : i32 to vector<128x1xi32>
    %9 = arith.cmpi slt, %5, %8 : vector<128x1xi32>
    %c0_i32_3 = arith.constant 0 : i32
    %10 = arith.cmpi slt, %3, %c0_i32_3 : i32
    %11 = vector.broadcast %10 : i1 to vector<128x1xi1>
    %12 = vector.broadcast %11 : vector<128x1xi1> to vector<128x1xi1>
    %13 = arith.xori %9, %12 : vector<128x1xi1>
    %14 = arith.andi %13, %7 : vector<128x1xi1>
    %15 = vector.broadcast %3 : i32 to vector<128x1xi32>
    %16 = arith.addi %5, %15 : vector<128x1xi32>
    %17 = arith.select %14, %16, %5 : vector<128x1xi1>, vector<128x1xi32>
    %c0_i32_4 = arith.constant 0 : i32
    %18 = vector.broadcast %c0_i32_4 : i32 to vector<128x1xi32>
    %19 = arith.cmpi ne, %17, %18 : vector<128x1xi32>
    %20 = arith.extui %19 : vector<128x1xi1> to vector<128x1xi32>
    %21 = arith.sitofp %20 : vector<128x1xi32> to vector<128x1xf32>
    %c16_i32_5 = arith.constant 16 : i32
    %c0_i32_6 = arith.constant 0 : i32
    %22 = arith.cmpi eq, %c16_i32_5, %c0_i32_6 : i32
    %c1_i32_7 = arith.constant 1 : i32
    %23 = arith.select %22, %c1_i32_7, %c16_i32_5 : i32
    %24 = vector.broadcast %23 : i32 to vector<128x1xi32>
    %25 = arith.remsi %1, %24 : vector<128x1xi32>
    %c0_i32_8 = arith.constant 0 : i32
    %26 = vector.broadcast %c0_i32_8 : i32 to vector<128x1xi32>
    %27 = arith.cmpi ne, %25, %26 : vector<128x1xi32>
    %c0_i32_9 = arith.constant 0 : i32
    %28 = vector.broadcast %c0_i32_9 : i32 to vector<128x1xi32>
    %29 = arith.cmpi slt, %25, %28 : vector<128x1xi32>
    %c0_i32_10 = arith.constant 0 : i32
    %30 = arith.cmpi slt, %23, %c0_i32_10 : i32
    %31 = vector.broadcast %30 : i1 to vector<128x1xi1>
    %32 = vector.broadcast %31 : vector<128x1xi1> to vector<128x1xi1>
    %33 = arith.xori %29, %32 : vector<128x1xi1>
    %34 = arith.andi %33, %27 : vector<128x1xi1>
    %35 = vector.broadcast %23 : i32 to vector<128x1xi32>
    %36 = arith.addi %25, %35 : vector<128x1xi32>
    %37 = arith.select %34, %36, %25 : vector<128x1xi1>, vector<128x1xi32>
    %c15_i32 = arith.constant 15 : i32
    %38 = vector.broadcast %c15_i32 : i32 to vector<128x1xi32>
    %39 = arith.cmpi ne, %37, %38 : vector<128x1xi32>
    %40 = arith.extui %39 : vector<128x1xi1> to vector<128x1xi32>
    %41 = arith.sitofp %40 : vector<128x1xi32> to vector<128x1xf32>
    %42 = arith.truncf %0 : vector<128x128xf32> to vector<128x128xbf16>
    %c0_11 = arith.constant 0 : index
    %c0_12 = arith.constant 0 : index
    %43 = vector.load %arg2[%c0_11, %c0_12] : memref<128x384xbf16, #tpu.memory_space<vmem>>, vector<128x384xbf16>
    %cst = arith.constant dense<0.000000e+00> : vector<128x384xf32>
    %44 = tpu.matmul %42, %43, %cst {dimension_numbers = #tpu.dot_dimension_numbers<[1], [0], [0], [1], [0, 0, 1, 1], [], []>} : vector<128x128xbf16>, vector<128x384xbf16>, vector<128x384xf32> -> vector<128x384xf32>
    %45 = vector.extract_strided_slice %44 {offsets = [0, 0], sizes = [128, 128], strides = [1, 1]} : vector<128x384xf32> to vector<128x128xf32>
    %46 = vector.extract_strided_slice %44 {offsets = [0, 128], sizes = [128, 128], strides = [1, 1]} : vector<128x384xf32> to vector<128x128xf32>
    %47 = vector.extract_strided_slice %44 {offsets = [0, 256], sizes = [128, 128], strides = [1, 1]} : vector<128x384xf32> to vector<128x128xf32>
    %c1_i32_13 = arith.constant 1 : i32
    %48 = tpu.dynamic_rotate %45 by %c1_i32_13 dim 0 : vector<128x128xf32>, i32 -> vector<128x128xf32>
    %49 = vector.broadcast %21 : vector<128x1xf32> to vector<128x128xf32>
    %50 = arith.mulf %49, %48 : vector<128x128xf32>
    %51 = arith.addf %50, %46 : vector<128x128xf32>
    %c127_i32 = arith.constant 127 : i32
    %52 = tpu.dynamic_rotate %47 by %c127_i32 dim 0 : vector<128x128xf32>, i32 -> vector<128x128xf32>
    %53 = vector.broadcast %41 : vector<128x1xf32> to vector<128x128xf32>
    %54 = arith.mulf %53, %52 : vector<128x128xf32>
    %55 = arith.addf %51, %54 : vector<128x128xf32>
    %c0_14 = arith.constant 0 : index
    %c0_15 = arith.constant 0 : index
    %56 = vector.load %arg3[%c0_14, %c0_15] : memref<1x128xf32, #tpu.memory_space<vmem>>, vector<1x128xf32>
    %57 = vector.broadcast %56 : vector<1x128xf32> to vector<128x128xf32>
    %58 = arith.addf %55, %57 : vector<128x128xf32>
    %cst_16 = arith.constant 0.000000e+00 : f32
    %59 = vector.broadcast %cst_16 : f32 to vector<128x128xf32>
    %60 = arith.maximumf %58, %59 : vector<128x128xf32>
    %61 = arith.truncf %60 : vector<128x128xf32> to vector<128x128xbf16>
    %c0_17 = arith.constant 0 : index
    %c0_18 = arith.constant 0 : index
    %62 = vector.load %arg4[%c0_17, %c0_18] : memref<128x384xbf16, #tpu.memory_space<vmem>>, vector<128x384xbf16>
    %cst_19 = arith.constant dense<0.000000e+00> : vector<128x384xf32>
    %63 = tpu.matmul %61, %62, %cst_19 {dimension_numbers = #tpu.dot_dimension_numbers<[1], [0], [0], [1], [0, 0, 1, 1], [], []>} : vector<128x128xbf16>, vector<128x384xbf16>, vector<128x384xf32> -> vector<128x384xf32>
    %64 = vector.extract_strided_slice %63 {offsets = [0, 0], sizes = [128, 128], strides = [1, 1]} : vector<128x384xf32> to vector<128x128xf32>
    %65 = vector.extract_strided_slice %63 {offsets = [0, 128], sizes = [128, 128], strides = [1, 1]} : vector<128x384xf32> to vector<128x128xf32>
    %66 = vector.extract_strided_slice %63 {offsets = [0, 256], sizes = [128, 128], strides = [1, 1]} : vector<128x384xf32> to vector<128x128xf32>
    %c1_i32_20 = arith.constant 1 : i32
    %67 = tpu.dynamic_rotate %64 by %c1_i32_20 dim 0 : vector<128x128xf32>, i32 -> vector<128x128xf32>
    %68 = vector.broadcast %21 : vector<128x1xf32> to vector<128x128xf32>
    %69 = arith.mulf %68, %67 : vector<128x128xf32>
    %70 = arith.addf %69, %65 : vector<128x128xf32>
    %c127_i32_21 = arith.constant 127 : i32
    %71 = tpu.dynamic_rotate %66 by %c127_i32_21 dim 0 : vector<128x128xf32>, i32 -> vector<128x128xf32>
    %72 = vector.broadcast %41 : vector<128x1xf32> to vector<128x128xf32>
    %73 = arith.mulf %72, %71 : vector<128x128xf32>
    %74 = arith.addf %70, %73 : vector<128x128xf32>
    %c0_22 = arith.constant 0 : index
    %c0_23 = arith.constant 0 : index
    %75 = vector.load %arg5[%c0_22, %c0_23] : memref<1x128xf32, #tpu.memory_space<vmem>>, vector<1x128xf32>
    %76 = vector.broadcast %75 : vector<1x128xf32> to vector<128x128xf32>
    %77 = arith.addf %74, %76 : vector<128x128xf32>
    %78 = arith.addf %77, %0 : vector<128x128xf32>
    %c0_24 = arith.constant 0 : index
    %c0_25 = arith.constant 0 : index
    %79 = vector.load %arg6[%c0_24, %c0_25] : memref<128x128xf32, #tpu.memory_space<vmem>>, vector<128x128xf32>
    tpu.vector_store %arg6[%c0_24, %c0_25], %78 {strides = array<i32>} : memref<128x128xf32, #tpu.memory_space<vmem>>, vector<128x128xf32>,
    return
  }
  func.func @transform_0(%arg0: i32) -> (i32, i32) {
    %c0_i32 = arith.constant 0 : i32
    %c0_i32_0 = arith.constant 0 : i32
    return %arg0, %c0_i32 : i32, i32
  }
  func.func @transform_1(%arg0: i32) -> (i32, i32) {
    %c0_i32 = arith.constant 0 : i32
    %c0_i32_0 = arith.constant 0 : i32
    %c0_i32_1 = arith.constant 0 : i32
    return %c0_i32, %c0_i32_0 : i32, i32
  }
  func.func @transform_2(%arg0: i32) -> (i32, i32) {
    %c0_i32 = arith.constant 0 : i32
    %c0_i32_0 = arith.constant 0 : i32
    %c0_i32_1 = arith.constant 0 : i32
    return %c0_i32, %c0_i32_0 : i32, i32
  }
  func.func @transform_3(%arg0: i32) -> (i32, i32) {
    %c0_i32 = arith.constant 0 : i32
    %c0_i32_0 = arith.constant 0 : i32
    %c0_i32_1 = arith.constant 0 : i32
    return %c0_i32, %c0_i32_0 : i32, i32
  }
  func.func @transform_4(%arg0: i32) -> (i32, i32) {
    %c0_i32 = arith.constant 0 : i32
    %c0_i32_0 = arith.constant 0 : i32
    %c0_i32_1 = arith.constant 0 : i32
    return %c0_i32, %c0_i32_0 : i32, i32
  }
  func.func @transform_5(%arg0: i32) -> (i32, i32) {
    %c0_i32 = arith.constant 0 : i32
    %c0_i32_0 = arith.constant 0 : i32
    return %arg0, %c0_i32 : i32, i32
  }
}

</mosaic_0001>

<bundles_post_ra>
// kernel: psm_basic_block.1
= control target key start
LH: loop header
LB: loop body
LE: loop exit
PB: predicated region body
PF: predicated region fallthrough
CT: control target
= control target key end

     0   :  { %s2012_s18 = smov 0   ;;  %s2685_s0 = inlined_call_operand.vmem [shape: f32[256,128], index: 0, kind: input, shape index: {}]   ;;  %s2686_s1 = inlined_call_operand.vmem [shape: bf16[128,384], index: 1, kind: input, shape index: {}]   ;;  %s2687_s2 = inlined_call_operand.vmem [shape: f32[1,128], index: 2, kind: input, shape index: {}]   ;;  %s2688_s3 = inlined_call_operand.vmem [shape: bf16[128,384], index: 3, kind: input, shape index: {}]   ;;  %s2689_s4 = inlined_call_operand.vmem [shape: f32[1,128], index: 4, kind: input, shape index: {}]   ;;  %s2690_s5 = inlined_call_operand.vmem [shape: f32[256,128], index: 5, kind: output, shape index: {}]  }
   0x1 LB: > { %s1714_s19 = sadd.s32 4294967295, %s1978_s18   ;;  %p1718_p0 = scmp.ge.s32.totalorder %s1978_s18, 1  ;;  %s1978_s18 = sphi %s2012_s18, %s15_s18  }
   0x2   : > { %p188_p1 = scmp.lt.s32.totalorder %s1978_s18, 3 }
   0x4   : > { %p189_p2 = pnand %p1718_p0, %p188_p1 }
   0x5   : > { %v1897_v0 = vld [vmem:[%s2686_s1 + $0x4] ss:$12 sps:$4 sm:$0xff] (!%p189_p2)   ;;  %s1719_s22 = sshll.u32 (!%p189_p2), %s1714_s19, 4  ;;  %v1899_v1 = vld [vmem:[%s2686_s1 + $0x8] ss:$12 sps:$4 sm:$0xff] (!%p189_p2)   ;;  %v1980_v2 = vmov (!%p189_p2), 0  }
   0x6   : > { %192 = sbr.rel (%p189_p2) target bundleno = 607 (0x25f), region = 40  ;;  %750 = vmatprep.mubr.bf16.mxu0 (!%p189_p2), %v1980_v2  ;;  %718 = vmatprep.subr.bf16.mxu0 (!%p189_p2), %v1897_v0  ;;  %v1900_v3 = vld [vmem:[%s2686_s1] ss:$12 sps:$4 sm:$0xff] (!%p189_p2)   ;;  %p217_p3 = scmp.lt.s32.totalorder (!%p189_p2), %s1719_s22, 31  ;;  %v1901_v4 = vld [vmem:[%s2686_s1 + $0x1c] ss:$12 sps:$4 sm:$0xff] (!%p189_p2)  }
   0x7   : > { %1823 = vmatprep.subr.bf16.mxu1 (!%p189_p2), %v1899_v1  ;;  %719 = vmatpush1.bf16.msra.mxu0 (!%p189_p2), %v1900_v3  ;;  %v1903_v5 = vld [vmem:[%s2686_s1 + $0x20] ss:$12 sps:$4 sm:$0xff] (!%p189_p2)   ;;  %v1904_v6 = vld [vmem:[%s2686_s1 + $0x18] ss:$12 sps:$4 sm:$0xff] (!%p189_p2)   ;;  %v1908_v9 = vld [vmem:[%s2686_s1 + $0x30] ss:$12 sps:$4 sm:$0xff] (!%p189_p2)  }
   0x8   : > { %1824 = vmatpush3.bf16.msra.mxu1 (!%p189_p2), %v1899_v1  ;;  %720 = vmatprep.subr.bf16.mxu0 (!%p189_p2), %v1901_v4  ;;  %v1905_v7 = vld [vmem:[%s2686_s1 + $0x34] ss:$12 sps:$4 sm:$0xff] (!%p189_p2)   ;;  %v1907_v8 = vld [vmem:[%s2686_s1 + $0x38] ss:$12 sps:$4 sm:$0xff] (!%p189_p2)   ;;  %v1911_v11 = vld [vmem:[%s2686_s1 + $0x50] ss:$12 sps:$4 sm:$0xff] (!%p189_p2)  }
   0x9   : > { %1825 = vmatprep.subr.bf16.mxu1 (!%p189_p2), %v1903_v5  ;;  %v1909_v10 = vld [vmem:[%s2686_s1 + $0x4c] ss:$12 sps:$4 sm:$0xff] (!%p189_p2)   ;;  %v1912_v12 = vld [vmem:[%s2686_s1 + $0x48] ss:$12 sps:$4 sm:$0xff] (!%p189_p2)   ;;  %v1913_v13 = vld [vmem:[%s2686_s1 + $0x64] ss:$12 sps:$4 sm:$0xff] (!%p189_p2)  }
   0xa   : > { %v1915_v14 = vld [vmem:[%s2686_s1 + $0x68] ss:$12 sps:$4 sm:$0xff] (!%p189_p2)   ;;  %v1916_v15 = vld [vmem:[%s2686_s1 + $0x60] ss:$12 sps:$4 sm:$0xff] (!%p189_p2)   ;;  %v1920_v20 = vld [vmem:[%s2686_s1 + $0x78] ss:$12 sps:$4 sm:$0xff] (!%p189_p2)  }
   0xb   : > { %721 = vmatpush1.bf16.msra.mxu0 (!%p189_p2), %v1904_v6  ;;  %v1917_v16 = vld [vmem:[%s2686_s1 + $0x7c] ss:$12 sps:$4 sm:$0xff] (!%p189_p2)   ;;  %v1919_v17 = vld [vmem:[%s2686_s1 + $0x80] ss:$12 sps:$4 sm:$0xff] (!%p189_p2)   ;;  %v1923_v23 = vld [vmem:[%s2686_s1 + $0x98] ss:$12 sps:$4 sm:$0xff] (!%p189_p2)  }
   0xc   : > { %1826 = vmatpush3.bf16.msra.mxu1 (!%p189_p2), %v1903_v5  ;;  %722 = vmatprep.subr.bf16.mxu0 (!%p189_p2), %v1905_v7  ;;  %v1921_v22 = vld [vmem:[%s2686_s1 + $0x94] ss:$12 sps:$4 sm:$0xff] (!%p189_p2)   ;;  %v1924_v24 = vld [vmem:[%s2686_s1 + $0x90] ss:$12 sps:$4 sm:$0xff] (!%p189_p2)   ;;  %v1925_v25 = vld [vmem:[%s2686_s1 + $0xac] ss:$12 sps:$4 sm:$0xff] (!%p189_p2)  }
   0xd   : > { %s2710_s22 = smov (!%p217_p3, %s1719_s22), 31  ;;  %1827 = vmatprep.subr.bf16.mxu1 %v1907_v8  ;;  %v1927_v26 = vld [vmem:[%s2686_s1 + $0xb0] ss:$12 sps:$4 sm:$0xff]   ;;  %v1928_v27 = vld [vmem:[%s2686_s1 + $0xa8] ss:$12 sps:$4 sm:$0xff]  }
   0xe   : > { %s1720_s21 = sshll.u32 %s2710_s22, 3  ;;  %v1931_v49 = vld [vmem:[%s2688_s3 + $0x4] ss:$12 sps:$4 sm:$0xff]   ;;  %v1929_v50 = vld [vmem:[%s2688_s3] ss:$12 sps:$4 sm:$0xff]  }
   0xf   : > { %723 = vmatpush1.bf16.msra.mxu0 %v1908_v9  ;;  %s2074_s6 = scalar_lea.vmem %s2685_s0, %s1720_s21  ;;  %v1932_v51 = vld [vmem:[%s2688_s3 + $0x8] ss:$12 sps:$4 sm:$0xff]   ;;  %v1933_v53 = vld [vmem:[%s2688_s3 + $0x18] ss:$12 sps:$4 sm:$0xff]   ;;  %v1936_v54 = vld [vmem:[%s2688_s3 + $0x20] ss:$12 sps:$4 sm:$0xff]   ;;  %s2541_s16 = scalar_lea.vmem %s2690_s5, %s1720_s21 }
  0x10   : > { %1828 = vmatpush3.bf16.msra.mxu1 %v1907_v8  ;;  %724 = vmatprep.subr.bf16.mxu0 %v1909_v10  ;;  %v229_v18 = vld [vmem:[%s2074_s6] sm:$0xff]  ;;  %v2084_v19 = vld [vmem:[%s2074_s6 + $0x8] sm:$0xff]  ;;  %v2109_v28 = vld [vmem:[%s2074_s6 + $0x10] sm:$0xff]  ;;  %v245_v10 = vlaneseq }
  0x11   : > { %1829 = vmatprep.subr.bf16.mxu1 %v1911_v11  ;;  %v550_v21 = vpack.c.bf16 %v2084_v19, %v229_v18  ;;  %v2112_v29 = vld [vmem:[%s2074_s6 + $0x18] sm:$0xff]  ;;  %v233_v30 = vld [vmem:[%s2074_s6 + $0x20] sm:$0xff]  ;;  %v234_v31 = vld [vmem:[%s2074_s6 + $0x28] sm:$0xff] }
  0x12   : > { %v551_v32 = vpack.c.bf16 %v2112_v29, %v2109_v28  ;;  %v552_v33 = vpack.c.bf16 %v234_v31, %v233_v30  ;;  %v2120_v34 = vld [vmem:[%s2074_s6 + $0x30] sm:$0xff]  ;;  %v2123_v35 = vld [vmem:[%s2074_s6 + $0x38] sm:$0xff]  ;;  %v237_v36 = vld [vmem:[%s2074_s6 + $0x40] sm:$0xff] }
  0x13   : > { %725 = vmatpush1.bf16.msra.mxu0 %v1912_v12  ;;  %1839 = vmatprep.mubr.bf16.mxu1 %v550_v21  ;;  %v238_v37 = vld [vmem:[%s2074_s6 + $0x48] sm:$0xff]  ;;  %v553_v38 = vpack.c.bf16 %v2123_v35, %v2120_v34  ;;  %v239_v40 = vld [vmem:[%s2074_s6 + $0x50] sm:$0xff]  ;;  %v240_v41 = vld [vmem:[%s2074_s6 + $0x58] sm:$0xff] }
  0x14   : > { %1830 = vmatpush3.bf16.msra.mxu1 %v1911_v11  ;;  %726 = vmatprep.subr.bf16.mxu0 %v1913_v13  ;;  %v554_v39 = vpack.c.bf16 %v238_v37, %v237_v36  ;;  %v241_v42 = vld [vmem:[%s2074_s6 + $0x60] sm:$0xff]  ;;  %v242_v43 = vld [vmem:[%s2074_s6 + $0x68] sm:$0xff]  ;;  %v555_v44 = vpack.c.bf16 %v240_v41, %v239_v40  ;;  %v243_v46 = vld [vmem:[%s2074_s6 + $0x70] sm:$0xff]  ;;  %v2214_v11 = vshrl.u32 %v245_v10, 7 }
  0x15   : > { %1831 = vmatprep.subr.bf16.mxu1 %v1915_v14  ;;  %v556_v45 = vpack.c.bf16 %v242_v43, %v241_v42  ;;  %v244_v47 = vld [vmem:[%s2074_s6 + $0x78] sm:$0xff]  ;;  %v1939_v55 = vld [vmem:[%s2688_s3 + $0x34] ss:$12 sps:$4 sm:$0xff]   ;;  %v1947_v61 = vld [vmem:[%s2688_s3 + $0x64] ss:$12 sps:$4 sm:$0xff]  }
  0x16   : > { %v557_v48 = vpack.c.bf16 %v244_v47, %v243_v46  ;;  %v1935_v52 = vld [vmem:[%s2688_s3 + $0x1c] ss:$12 sps:$4 sm:$0xff]   ;;  %v1940_v57 = vld [vmem:[%s2688_s3 + $0x38] ss:$12 sps:$4 sm:$0xff]   ;;  %v1945_v62 = vld [vmem:[%s2688_s3 + $0x60] ss:$12 sps:$4 sm:$0xff]  }
  0x17   : > { %727 = vmatpush1.bf16.msra.mxu0 %v1916_v15  ;;  %v1937_v56 = vld [vmem:[%s2688_s3 + $0x30] ss:$12 sps:$4 sm:$0xff]   ;;  %v1943_v58 = vld [vmem:[%s2688_s3 + $0x4c] ss:$12 sps:$4 sm:$0xff]   ;;  %v1941_v59 = vld [vmem:[%s2688_s3 + $0x48] ss:$12 sps:$4 sm:$0xff]  }
  0x18   : > { %1832 = vmatpush3.bf16.msra.mxu1 %v1915_v14  ;;  %728 = vmatprep.subr.bf16.mxu0 %v1917_v16  ;;  %v1944_v60 = vld [vmem:[%s2688_s3 + $0x50] ss:$12 sps:$4 sm:$0xff]   ;;  %v1948_v63 = vld [vmem:[%s2688_s3 + $0x68] ss:$12 sps:$4 sm:$0xff]   ;;  %v1949_v1 = vld [vmem:[%s2688_s3 + $0x78] ss:$12 sps:$4 sm:$0xff]  }
  0x19   : > { %1833 = vmatprep.subr.bf16.mxu1 %v1919_v17  ;;  %v1951_v0 = vld [vmem:[%s2688_s3 + $0x7c] ss:$12 sps:$4 sm:$0xff]   ;;  %v1952_v3 = vld [vmem:[%s2688_s3 + $0x80] ss:$12 sps:$4 sm:$0xff]   ;;  %v1956_v6 = vld [vmem:[%s2688_s3 + $0x98] ss:$12 sps:$4 sm:$0xff]  }
  0x1a   : > { %v1955_v4 = vld [vmem:[%s2688_s3 + $0x94] ss:$12 sps:$4 sm:$0xff]   ;;  %v1953_v5 = vld [vmem:[%s2688_s3 + $0x90] ss:$12 sps:$4 sm:$0xff]   ;;  %v1959_v7 = vld [vmem:[%s2688_s3 + $0xac] ss:$12 sps:$4 sm:$0xff]  }
  0x1b   : > { %729 = vmatpush1.bf16.msra.mxu0 %v1920_v20  ;;  %v1957_v8 = vld [vmem:[%s2688_s3 + $0xa8] ss:$12 sps:$4 sm:$0xff]   ;;  %v1960_v9 = vld [vmem:[%s2688_s3 + $0xb0] ss:$12 sps:$4 sm:$0xff]   ;;  %v247_v12 = vadd.s32 8, %v2214_v11  ;;  %v248_v13 = vadd.s32 16, %v2214_v11 }
  0x1c   : > { %1834 = vmatpush3.bf16.msra.mxu1 %v1919_v17  ;;  %730 = vmatprep.subr.bf16.mxu0 %v1921_v22  ;;  %v249_v15 = vadd.s32 24, %v2214_v11  ;;  %vm944_vm1 = vcmp.lt.s32.totalorder %v2214_v11, 1  ;;  %v251_v31 = vadd.s32 40, %v2214_v11  ;;  %vm1009_vm2 = vcmp.lt.s32.totalorder %v2214_v11, 7 }
  0x1d   : > { %1835 = vmatprep.subr.bf16.mxu1 %v1923_v23  ;;  %v273_v14 = vand.u32 15, %v247_v12  ;;  %v280_v18 = vand.u32 15, %v248_v13  ;;  %v256_v42 = vadd.s32 80, %v2214_v11 }
  0x1f   : > { %731 = vmatpush1.bf16.msra.mxu0 %v1924_v24  ;;  %vm2225_vm0 = vcmp.ne.s32.totalorder %v273_v14, 15  ;;  %v250_v24 = vadd.s32 32, %v2214_v11  ;;  %vm2240_vm3 = vcmp.ne.s32.totalorder %v280_v18, 0 }
  0x20   : > { %1836 = vmatpush3.bf16.msra.mxu1 %v1923_v23  ;;  %732 = vmatprep.subr.bf16.mxu0 %v1925_v25  ;;  %v287_v23 = vand.u32 15, %v249_v15 }
  0x21   : > { %1837 = vmatprep.subr.bf16.mxu1 %v1927_v26  ;;  %v294_v46 = vand.u32 15, %v250_v24 }
  0x22   : > { %vm2250_vm4 = vcmp.ne.s32.totalorder %v287_v23, 15  ;;  %v254_v23 = vadd.s32 64, %v2214_v11 }
  0x23   : > { %733 = vmatpush1.bf16.msra.mxu0 %v1928_v27  ;;  %vm2277_vm5 = vcmp.ne.s32.totalorder %v294_v46, 0 }
  0x24   : > { %1838 = vmatpush3.bf16.msra.mxu1 %v1927_v26  ;;  %1855 = vmatprep.subr.bf16.mxu0 %v1932_v51 }
  0x25   : > { %1265 = vmatprep.subr.bf16.mxu1 %v1931_v49 }
  0x26   : > { %751 = vmatmul.mubr.bf16.vlgmr.msra.gmra.mrb[0].mxu0 %v550_v21 }
  0x27   : > { %1840 = vmatmul.mubr.bf16.vlgmr.msra.gmra.mrb[0].mxu1 %v551_v32  ;;  %760 = vmatprep.mubr.bf16.mxu0 %v1980_v2 }
  0x28   : > { %1843 = vmatprep.mubr.bf16.mxu1 %v552_v33  ;;  %1266 = vmatpush1.bf16.msra.mxu1 %v1929_v50  ;;  %v301_v50 = vand.u32 15, %v251_v31 }
  0x29   : > { %1856 = vmatpush3.bf16.msra.mxu0 %v1932_v51  ;;  %1267 = vmatprep.subr.bf16.mxu1 %v1935_v52  ;;  %v252_v52 = vadd.s32 48, %v2214_v11 }
  0x2a   : > { %1857 = vmatprep.subr.bf16.mxu0 %v1936_v54  ;;  %vm2281_vm6 = vcmp.ne.s32.totalorder %v301_v50, 15  ;;  %v255_v50 = vadd.s32 72, %v2214_v11 }
  0x2b   : > { %v308_v10 = vand.u32 15, %v252_v52 }
  0x2c   : > { %1268 = vmatpush1.bf16.msra.mxu1 %v1933_v53 }
  0x2d   : > { %1858 = vmatpush3.bf16.msra.mxu0 %v1936_v54  ;;  %1269 = vmatprep.subr.bf16.mxu1 %v1939_v55  ;;  %v253_v55 = vadd.s32 56, %v2214_v11  ;;  %vm2317_vm7 = vcmp.ne.s32.totalorder %v308_v10, 0 }
  0x2e   : > { %761 = vmatmul.mubr.bf16.gmra.mrb[4].mxu0 %v551_v32  ;;  %1859 = vmatprep.subr.bf16.mxu0 %v1940_v57 }
  0x2f   : > { %1844 = vmatmul.mubr.bf16.gmra.mrb[4].mxu1 %v553_v38  ;;  %770 = vmatprep.mubr.bf16.mxu0 %v1980_v2  ;;  %v315_v15 = vand.u32 15, %v253_v55 }
  0x30   : > { %1847 = vmatprep.mubr.bf16.mxu1 %v554_v39  ;;  %1270 = vmatpush1.bf16.msra.mxu1 %v1937_v56 }
  0x31   : > { %1860 = vmatpush3.bf16.msra.mxu0 %v1940_v57  ;;  %1271 = vmatprep.subr.bf16.mxu1 %v1943_v58  ;;  %vm2321_vm8 = vcmp.ne.s32.totalorder %v315_v15, 15 }
  0x32   : > { %1861 = vmatprep.subr.bf16.mxu0 %v1944_v60 }
  0x34   : > { %1272 = vmatpush1.bf16.msra.mxu1 %v1941_v59 }
  0x35   : > { %1862 = vmatpush3.bf16.msra.mxu0 %v1944_v60  ;;  %1273 = vmatprep.subr.bf16.mxu1 %v1947_v61 }
  0x36   : > { %771 = vmatmul.mubr.bf16.gmra.mrb[8].mxu0 %v552_v33  ;;  %1863 = vmatprep.subr.bf16.mxu0 %v1948_v63 }
  0x37   : > { %1848 = vmatmul.mubr.bf16.gmra.mrb[8].mxu1 %v555_v44  ;;  %780 = vmatprep.mubr.bf16.mxu0 %v1980_v2 }
  0x38   : > { %1851 = vmatprep.mubr.bf16.mxu1 %v556_v45  ;;  %1274 = vmatpush1.bf16.msra.mxu1 %v1945_v62 }
  0x39   : > { %1864 = vmatpush3.bf16.msra.mxu0 %v1948_v63  ;;  %1275 = vmatprep.subr.bf16.mxu1 %v1951_v0 }
  0x3a   : > { %1865 = vmatprep.subr.bf16.mxu0 %v1952_v3 }
  0x3c   : > { %1276 = vmatpush1.bf16.msra.mxu1 %v1949_v1 }
  0x3d   : > { %1866 = vmatpush3.bf16.msra.mxu0 %v1952_v3  ;;  %1277 = vmatprep.subr.bf16.mxu1 %v1955_v4 }
  0x3e   : > { %781 = vmatmul.mubr.bf16.gmra.mrb[12].mxu0 %v553_v38  ;;  %1867 = vmatprep.subr.bf16.mxu0 %v1956_v6 }
  0x3f   : > { %1852 = vmatmul.mubr.bf16.gmra.mrb[12].mxu1 %v557_v48  ;;  %790 = vmatprep.mubr.bf16.mxu0 %v1980_v2 }
  0x40   : > { %1297 = vmatprep.mubr.bf16.mxu1 %v1980_v2  ;;  %1278 = vmatpush1.bf16.msra.mxu1 %v1953_v5 }
  0x41   : > { %1868 = vmatpush3.bf16.msra.mxu0 %v1956_v6  ;;  %1279 = vmatprep.subr.bf16.mxu1 %v1959_v7 }
  0x42   : > { %1869 = vmatprep.subr.bf16.mxu0 %v1960_v9 }
  0x44   : > { %1280 = vmatpush1.bf16.msra.mxu1 %v1957_v8 }
  0x45   : > { %1870 = vmatpush3.bf16.msra.mxu0 %v1960_v9 }
  0x46   : > { %791 = vmatmul.mubr.bf16.gmra.mrb[16].mxu0 %v554_v39  ;;  %v1981_v39 = vmov 0.0  }
  0x47   : > { %800 = vmatprep.mubr.bf16.mxu0 %v1980_v2  ;;  %v2238_v40 = vsel %vm2225_vm0, 1.0, %v1981_v39  ;;  %v2270_v58 = vsel %vm2240_vm3, 1.0, %v1981_v39  ;;  %v2275_v61 = vsel %vm2250_vm4, 1.0, %v1981_v39  ;;  %v2305_v31 = vsel %vm2281_vm6, 1.0, %v1981_v39 }
  0x4e   : > { %801 = vmatmul.mubr.bf16.gmra.mrb[20].mxu0 %v555_v44 }
  0x4f   : > { %810 = vmatprep.mubr.bf16.mxu0 %v1980_v2 }
  0x56   : > { %811 = vmatmul.mubr.bf16.gmra.mrb[24].mxu0 %v556_v45 }
  0x57   : > { %820 = vmatprep.mubr.bf16.mxu0 %v1980_v2 }
  0x5e   : > { %821 = vmatmul.mubr.bf16.gmra.mrb[28].mxu0 %v557_v48 }
  0xf9   : > { %v2219_v16 = vpop.f32.mrb[0].mxu0 }
  0xfa   : > { %v1841_v17 = vpop.f32.mrb[0].mxu1  ;;  %v2221_v20 = vpop.f32.mrb[1].mxu0  ;;  %v928_v32 = vrot.slane %v2219_v16, 7 }
  0xfb   : > { %v2223_v21 = vpop.f32.mrb[1].mxu1  ;;  %v995_v25 = vrot.slane %v1841_v17, 1  ;;  %v756_v27 = vpop.f32.mrb[2].mxu0 }
  0xfc   : > { %v993_v26 = vrot.slane %v2223_v21, 1  ;;  %v1842_v30 = vpop.f32.mrb[2].mxu1  ;;  %v929_v33 = vrot.slane %v756_v27, 7  ;;  %v758_v37 = vpop.f32.mrb[3].mxu0 }
  0xfd   : > { %v996_v36 = vrot.slane %v1842_v30, 1  ;;  %v868_v38 = vpop.f32.mrb[3].mxu1 }
  0xfe   : > { %v994_v41 = vrot.slane %v868_v38, 1  ;;  %v959_v43 = vsel %vm944_vm1, %v928_v32, %v929_v33 }
  0xff   : > { %v1022_v44 = vsel %vm1009_vm2, %v995_v25, %v996_v36  ;;  %v978_v47 = vadd.f32 %v959_v43, %v758_v37 }
 0x100   : > { %v1023_v48 = vsel %vm1009_vm2, %v994_v41, %v995_v25  ;;  %v2260_v49 = vsel %vm1009_vm2, %v993_v26, %v994_v41  ;;  %v2315_v41 = vsel %vm2277_vm5, 1.0, %v1981_v39 }
 0x101   : > { %v1027_v51 = vmul.f32 %v2238_v40, %v1023_v48  ;;  %v762_v53 = vpop.f32.mrb[4].mxu0 }
 0x102   : > { %v1845_v54 = vpop.f32.mrb[4].mxu1  ;;  %v930_v57 = vrot.slane %v762_v53, 7  ;;  %v764_v59 = vpop.f32.mrb[5].mxu0 }
 0x103   : > { %v2265_v56 = vadd.f32 %v1027_v51, %v978_v47  ;;  %v881_v60 = vpop.f32.mrb[5].mxu1  ;;  %v999_v62 = vrot.slane %v1845_v54, 1  ;;  %v766_v63 = vpop.f32.mrb[6].mxu0 }
 0x104   : > { %v997_v0 = vrot.slane %v881_v60, 1  ;;  %v1846_v3 = vpop.f32.mrb[6].mxu1  ;;  %v958_v5 = vsel %vm944_vm1, %v929_v33, %v930_v57  ;;  %v931_v6 = vrot.slane %v766_v63, 7  ;;  %v768_v7 = vpop.f32.mrb[7].mxu0  ;;  %v2310_v33 = vld [vmem:[%s2687_s2] ss:$0 sm:$0xff] }
 0x105   : > { %v1000_v8 = vrot.slane %v1846_v3, 1  ;;  %v884_v9 = vpop.f32.mrb[7].mxu1  ;;  %v963_v12 = vmul.f32 %v2270_v58, %v958_v5 }
 0x106   : > { %v1021_v13 = vsel %vm1009_vm2, %v996_v36, %v997_v0  ;;  %v998_v14 = vrot.slane %v884_v9, 1  ;;  %v957_v17 = vsel %vm944_vm1, %v930_v57, %v931_v6 }
 0x107   : > { %v1029_v18 = vmul.f32 %v2275_v61, %v1021_v13  ;;  %v2295_v22 = vsel %vm1009_vm2, %v999_v62, %v1000_v8  ;;  %v979_v24 = vadd.f32 %v963_v12, %v764_v59  ;;  %v980_v25 = vadd.f32 %v957_v17, %v768_v7 }
 0x108   : > { %v1019_v27 = vsel %vm1009_vm2, %v998_v14, %v999_v62  ;;  %v1020_v30 = vsel %vm1009_vm2, %v997_v0, %v998_v14  ;;  %v329_v12 = vand.u32 15, %v255_v50 }
 0x109   : > { %v1044_v36 = vadd.f32 %v1022_v44, %v979_v24  ;;  %v1045_v37 = vadd.f32 %v1029_v18, %v980_v25  ;;  %v772_v38 = vpop.f32.mrb[8].mxu0  ;;  %v322_v44 = vand.u32 15, %v254_v23  ;;  %v1031_v54 = vmul.f32 %v2305_v31, %v1019_v27 }
 0x10a   : > { %v1849_v43 = vpop.f32.mrb[8].mxu1  ;;  %v932_v45 = vrot.slane %v772_v38, 7  ;;  %v774_v46 = vpop.f32.mrb[9].mxu0  ;;  %v2351_v25 = vsel %vm2317_vm7, 1.0, %v1981_v39  ;;  %v2356_v27 = vsel %vm2321_vm8, 1.0, %v1981_v39  ;;  %vm2362_vm10 = vcmp.ne.s32.totalorder %v329_v12, 15 }
 0x10b   : > { %v897_v47 = vpop.f32.mrb[9].mxu1  ;;  %v1067_v51 = vadd.f32 %v2310_v33, %v1044_v36  ;;  %v1068_v52 = vadd.f32 %v2310_v33, %v1045_v37  ;;  %v776_v53 = vpop.f32.mrb[10].mxu0  ;;  %v1003_v63 = vrot.slane %v1849_v43, 1  ;;  %vm2358_vm9 = vcmp.ne.s32.totalorder %v322_v44, 0 }
 0x10c   : > { %v1001_v55 = vrot.slane %v897_v47, 1  ;;  %v1850_v57 = vpop.f32.mrb[10].mxu1  ;;  %v956_v59 = vsel %vm944_vm1, %v931_v6, %v932_v45  ;;  %v933_v60 = vrot.slane %v776_v53, 7  ;;  %v778_v62 = vpop.f32.mrb[11].mxu0 }
 0x10d   : > { %v1004_v0 = vrot.slane %v1850_v57, 1  ;;  %v900_v1 = vpop.f32.mrb[11].mxu1  ;;  %v1083_v3 = vmax.f32 %v1067_v51, 0.0  ;;  %v1084_v4 = vmax.f32 %v1068_v52, 0.0  ;;  %v965_v5 = vmul.f32 %v2315_v41, %v956_v59 }
 0x10e   : > { %v1017_v7 = vsel %vm1009_vm2, %v1000_v8, %v1001_v55  ;;  %v955_v9 = vsel %vm944_vm1, %v932_v45, %v933_v60  ;;  %v1002_v10 = vrot.slane %v900_v1, 1  ;;  %v257_v51 = vadd.s32 88, %v2214_v11 }
 0x10f   : > { %v2338_v6 = vsel %vm1009_vm2, %v1003_v63, %v1004_v0  ;;  %v2340_v13 = vpack.c.bf16 %v1084_v4, %v1083_v3  ;;  %v981_v14 = vadd.f32 %v965_v5, %v774_v46  ;;  %v982_v15 = vadd.f32 %v955_v9, %v778_v62 }
 0x110   : > { %v1015_v17 = vsel %vm1009_vm2, %v1002_v10, %v1003_v63  ;;  %v2346_v18 = vsel %vm1009_vm2, %v1001_v55, %v1002_v10  ;;  %v1033_v63 = vmul.f32 %v2356_v27, %v1017_v7 }
 0x111   : > { %v1046_v8 = vadd.f32 %v1020_v30, %v981_v14  ;;  %v1047_v23 = vadd.f32 %v1031_v54, %v982_v15  ;;  %v782_v24 = vpop.f32.mrb[12].mxu0 }
 0x112   : > { %v1853_v36 = vpop.f32.mrb[12].mxu1  ;;  %v934_v37 = vrot.slane %v782_v24, 7  ;;  %v784_v38 = vpop.f32.mrb[13].mxu0 }
 0x113   : > { %v913_v45 = vpop.f32.mrb[13].mxu1  ;;  %v1070_v46 = vadd.f32 %v2310_v33, %v1047_v23  ;;  %v786_v47 = vpop.f32.mrb[14].mxu0  ;;  %v1007_v48 = vrot.slane %v1853_v36, 1  ;;  %v1069_v59 = vadd.f32 %v2310_v33, %v1046_v8  ;;  %v2400_v8 = vsel %vm2358_vm9, 1.0, %v1981_v39 }
 0x114   : > { %v1005_v50 = vrot.slane %v913_v45, 1  ;;  %v1854_v52 = vpop.f32.mrb[14].mxu1  ;;  %v954_v44 = vsel %vm944_vm1, %v933_v60, %v934_v37  ;;  %v935_v53 = vrot.slane %v786_v47, 7  ;;  %v788_v54 = vpop.f32.mrb[15].mxu0  ;;  %v2405_v36 = vsel %vm2362_vm10, 1.0, %v1981_v39 }
 0x115   : > { %v1008_v55 = vrot.slane %v1854_v52, 1  ;;  %v916_v57 = vpop.f32.mrb[15].mxu1  ;;  %v967_v62 = vmul.f32 %v2351_v25, %v954_v44  ;;  %v1086_v4 = vmax.f32 %v1070_v46, 0.0  ;;  %v1085_v14 = vmax.f32 %v1069_v59, 0.0 }
 0x116   : > { %v1013_v1 = vsel %vm1009_vm2, %v1004_v0, %v1005_v50  ;;  %v1006_v3 = vrot.slane %v916_v57, 1  ;;  %v953_v5 = vsel %vm944_vm1, %v934_v37, %v935_v53  ;;  %v336_v37 = vand.u32 15, %v256_v42 }
 0x117   : > { %v2382_v60 = vsel %vm1009_vm2, %v1008_v55, %v993_v26  ;;  %v2386_v9 = vsel %vm1009_vm2, %v1007_v48, %v1008_v55  ;;  %v983_v10 = vadd.f32 %v967_v62, %v784_v38  ;;  %v984_v7 = vadd.f32 %v953_v5, %v788_v54 }
 0x118   : > { %v2390_v0 = vsel %vm1009_vm2, %v1006_v3, %v1007_v48  ;;  %v2394_v12 = vsel %vm1009_vm2, %v1005_v50, %v1006_v3  ;;  %v2407_v38 = vpack.c.bf16 %v1086_v4, %v1085_v14  ;;  %v343_v47 = vand.u32 15, %v257_v51 }
 0x119   : > { %v1048_v21 = vadd.f32 %v2295_v22, %v983_v10  ;;  %v1049_v15 = vadd.f32 %v1033_v63, %v984_v7  ;;  %v792_v26 = vpop.f32.mrb[16].mxu0  ;;  %v1035_v54 = vmul.f32 %v2405_v36, %v1015_v17  ;;  %vm464_vm11 = vcmp.ne.s32.totalorder %v336_v37, 0 }
 0x11a   : > { %v936_v23 = vrot.slane %v792_v26, 7  ;;  %v794_v24 = vpop.f32.mrb[17].mxu0  ;;  %v258_v55 = vadd.s32 96, %v2214_v11  ;;  %v259_v57 = vadd.s32 104, %v2214_v11  ;;  %vm513_vm12 = vcmp.ne.s32.totalorder %v343_v47, 15 }
 0x11b   : > { %v1071_v45 = vadd.f32 %v2310_v33, %v1048_v21  ;;  %v1072_v22 = vadd.f32 %v2310_v33, %v1049_v15  ;;  %v796_v46 = vpop.f32.mrb[18].mxu0  ;;  %v2423_v4 = vsel %vm464_vm11, 1.0, %v1981_v39  ;;  %v2426_v10 = vsel %vm513_vm12, 1.0, %v1981_v39 }
 0x11c   : > { %v952_v43 = vsel %vm944_vm1, %v935_v53, %v936_v23  ;;  %v937_v48 = vrot.slane %v796_v46, 7  ;;  %v798_v50 = vpop.f32.mrb[19].mxu0  ;;  %v350_v7 = vand.u32 15, %v258_v55  ;;  %v357_v14 = vand.u32 15, %v259_v57 }
 0x11d   : > { %v1087_v52 = vmax.f32 %v1071_v45, 0.0  ;;  %v1088_v44 = vmax.f32 %v1072_v22, 0.0  ;;  %v969_v30 = vmul.f32 %v2400_v8, %v952_v43  ;;  %v1037_v22 = vmul.f32 %v2426_v10, %v1013_v1 }
 0x11e   : > { %v951_v42 = vsel %vm944_vm1, %v936_v23, %v937_v48  ;;  %vm466_vm13 = vcmp.ne.s32.totalorder %v350_v7, 0  ;;  %vm515_vm14 = vcmp.ne.s32.totalorder %v357_v14, 15  ;;  %v260_v43 = vadd.s32 112, %v2214_v11 }
 0x11f   : > { %v985_v51 = vadd.f32 %v969_v30, %v794_v24  ;;  %v986_v59 = vadd.f32 %v951_v42, %v798_v50  ;;  %v2419_v53 = vpack.c.bf16 %v1088_v44, %v1087_v52  ;;  %v261_v44 = vadd.s32 120, %v2214_v11 }
 0x120   : > { %v2442_v1 = vsel %vm466_vm13, 1.0, %v1981_v39  ;;  %v266_v14 = vand.u32 15, %v2214_v11 }
 0x121   : > { %v1050_v62 = vadd.f32 %v2346_v18, %v985_v51  ;;  %v1051_v63 = vadd.f32 %v1035_v54, %v986_v59  ;;  %v802_v3 = vpop.f32.mrb[20].mxu0  ;;  %v2445_v51 = vsel %vm515_vm14, 1.0, %v1981_v39  ;;  %v364_v59 = vand.u32 15, %v260_v43 }
 0x122   : > { %v938_v17 = vrot.slane %v802_v3, 7  ;;  %v804_v5 = vpop.f32.mrb[21].mxu0  ;;  %vm454_vm3 = vcmp.ne.s32.totalorder %v266_v14, 0 }
 0x123   : > { %v1074_v21 = vadd.f32 %v2310_v33, %v1051_v63  ;;  %v806_v15 = vpop.f32.mrb[22].mxu0  ;;  %v1073_v26 = vadd.f32 %v2310_v33, %v1050_v62  ;;  %vm468_vm15 = vcmp.ne.s32.totalorder %v364_v59, 0 }
 0x124   : > { %v950_v18 = vsel %vm944_vm1, %v937_v48, %v938_v17  ;;  %v939_v23 = vrot.slane %v806_v15, 7  ;;  %v808_v24 = vpop.f32.mrb[23].mxu0 }
 0x125   : > { %v1090_v37 = vmax.f32 %v1074_v21, 0.0  ;;  %v971_v45 = vmul.f32 %v2423_v4, %v950_v18  ;;  %v1089_v46 = vmax.f32 %v1073_v26, 0.0  ;;  %v1039_v18 = vmul.f32 %v2445_v51, %v2390_v0 }
 0x126   : > { %v949_v47 = vsel %vm944_vm1, %v938_v17, %v939_v23  ;;  %v371_v17 = vand.u32 15, %v261_v44 }
 0x127   : > { %v987_v50 = vadd.f32 %v971_v45, %v804_v5  ;;  %v988_v52 = vadd.f32 %v949_v47, %v808_v24  ;;  %v2438_v48 = vpack.c.bf16 %v1090_v37, %v1089_v46 }
 0x128   : > { %vm517_vm0 = vcmp.ne.s32.totalorder %v371_v17, 15 }
 0x129   : > { %v1052_v30 = vadd.f32 %v2338_v6, %v987_v50  ;;  %v1053_v54 = vadd.f32 %v1037_v22, %v988_v52  ;;  %v812_v42 = vpop.f32.mrb[24].mxu0  ;;  %v2459_v50 = vsel %vm468_vm15, 1.0, %v1981_v39  ;;  %v2462_v0 = vsel %vm517_vm0, 1.0, %v1981_v39 }
 0x12a   : > { %v940_v55 = vrot.slane %v812_v42, 7  ;;  %v814_v57 = vpop.f32.mrb[25].mxu0 }
 0x12b   : > { %v1075_v62 = vadd.f32 %v2310_v33, %v1052_v30  ;;  %v1076_v63 = vadd.f32 %v2310_v33, %v1053_v54  ;;  %v816_v3 = vpop.f32.mrb[26].mxu0 }
 0x12c   : > { %v948_v6 = vsel %vm944_vm1, %v939_v23, %v940_v55  ;;  %v941_v5 = vrot.slane %v816_v3, 7  ;;  %v818_v7 = vpop.f32.mrb[27].mxu0 }
 0x12d   : > { %v1091_v21 = vmax.f32 %v1075_v62, 0.0  ;;  %v1092_v15 = vmax.f32 %v1076_v63, 0.0  ;;  %v973_v26 = vmul.f32 %v2442_v1, %v948_v6  ;;  %v1041_v63 = vmul.f32 %v2462_v0, %v2382_v60 }
 0x12e   : > { %v947_v24 = vsel %vm944_vm1, %v940_v55, %v941_v5  ;;  %v1066_v60 = vadd.f32 %v2310_v33, %v2265_v56 }
 0x12f   : > { %v989_v37 = vadd.f32 %v973_v26, %v814_v57  ;;  %v990_v45 = vadd.f32 %v947_v24, %v818_v7  ;;  %v1102_v22 = vpack.c.bf16 %v1092_v15, %v1091_v21 }
 0x131   : > { %v1054_v23 = vadd.f32 %v2394_v12, %v989_v37  ;;  %v1055_v46 = vadd.f32 %v1039_v18, %v990_v45  ;;  %v822_v47 = vpop.f32.mrb[28].mxu0  ;;  %v2469_v12 = vsel %vm454_vm3, 1.0, %v1981_v39 }
 0x132   : > { %v942_v43 = vrot.slane %v822_v47, 7  ;;  %v824_v52 = vpop.f32.mrb[29].mxu0 }
 0x133   : > { %v1078_v44 = vadd.f32 %v2310_v33, %v1055_v46  ;;  %v826_v30 = vpop.f32.mrb[30].mxu0  ;;  %v1077_v54 = vadd.f32 %v2310_v33, %v1054_v23  ;;  %v1082_v23 = vmax.f32 %v1066_v60, 0.0 }
 0x134   : > { %v946_v42 = vsel %vm944_vm1, %v941_v5, %v942_v43  ;;  %v943_v55 = vrot.slane %v826_v30, 7  ;;  %v828_v57 = vpop.f32.mrb[31].mxu0 }
 0x135   : > { %v1094_v59 = vmax.f32 %v1078_v44, 0.0  ;;  %v975_v62 = vmul.f32 %v2459_v50, %v946_v42  ;;  %v1093_v3 = vmax.f32 %v1077_v54, 0.0 }
 0x136   : > { %v960_v17 = vsel %vm944_vm1, %v943_v55, %v928_v32  ;;  %v945_v6 = vsel %vm944_vm1, %v942_v43, %v943_v55 }
 0x137   : > { %v991_v5 = vadd.f32 %v975_v62, %v824_v52  ;;  %v961_v39 = vmul.f32 %v2469_v12, %v960_v17  ;;  %v992_v7 = vadd.f32 %v945_v6, %v828_v57  ;;  %v1103_v14 = vpack.c.bf16 %v1094_v59, %v1093_v3  ;;  %v2530_v3 = vld [vmem:[%s2689_s4] ss:$0 sm:$0xff] }
 0x139   : > { %v1056_v21 = vadd.f32 %v2386_v9, %v991_v5  ;;  %v977_v15 = vadd.f32 %v961_v39, %v2221_v20  ;;  %v1057_v26 = vadd.f32 %v1041_v63, %v992_v7 }
 0x13b   : > { %v1079_v16 = vadd.f32 %v2310_v33, %v1056_v21  ;;  %v1042_v32 = vadd.f32 %v2260_v49, %v977_v15  ;;  %v1080_v18 = vadd.f32 %v2310_v33, %v1057_v26 }
 0x13d   : > { %v1095_v24 = vmax.f32 %v1079_v16, 0.0  ;;  %v1065_v37 = vadd.f32 %v2310_v33, %v1042_v32  ;;  %v1096_v45 = vmax.f32 %v1080_v18, 0.0 }
 0x13f   : > { %v1081_v46 = vmax.f32 %v1065_v37, 0.0  ;;  %v1104_v47 = vpack.c.bf16 %v1096_v45, %v1095_v24 }
 0x141   : > { %v1097_v9 = vpack.c.bf16 %v1082_v23, %v1081_v46 }
 0x143   : > { %1298 = vmatmul.mubr.bf16.vlgmr.msra.gmra.mrb[16].mxu1 %v1097_v9  ;;  %1871 = vmatprep.mubr.bf16.mxu0 %v1097_v9 }
 0x144   : > { %1872 = vmatmul.mubr.bf16.vlgmr.msra.gmra.mrb[32].mxu0 %v2340_v13  ;;  %1307 = vmatprep.mubr.bf16.mxu1 %v1980_v2 }
 0x145   : > { %1875 = vmatprep.mubr.bf16.mxu0 %v2407_v38 }
 0x14b   : > { %1308 = vmatmul.mubr.bf16.gmra.mrb[20].mxu1 %v2340_v13 }
 0x14c   : > { %1876 = vmatmul.mubr.bf16.gmra.mrb[36].mxu0 %v2419_v53  ;;  %1317 = vmatprep.mubr.bf16.mxu1 %v1980_v2 }
 0x14d   : > { %1879 = vmatprep.mubr.bf16.mxu0 %v2438_v48 }
 0x153   : > { %1318 = vmatmul.mubr.bf16.gmra.mrb[24].mxu1 %v2407_v38 }
 0x154   : > { %1880 = vmatmul.mubr.bf16.gmra.mrb[40].mxu0 %v1102_v22  ;;  %1327 = vmatprep.mubr.bf16.mxu1 %v1980_v2 }
 0x155   : > { %1883 = vmatprep.mubr.bf16.mxu0 %v1103_v14 }
 0x15b   : > { %1328 = vmatmul.mubr.bf16.gmra.mrb[28].mxu1 %v2419_v53 }
 0x15c   : > { %1884 = vmatmul.mubr.bf16.gmra.mrb[44].mxu0 %v1104_v47  ;;  %1337 = vmatprep.mubr.bf16.mxu1 %v1980_v2 }
 0x163   : > { %1338 = vmatmul.mubr.bf16.gmra.mrb[32].mxu1 %v2438_v48 }
 0x164   : > { %1347 = vmatprep.mubr.bf16.mxu1 %v1980_v2 }
 0x16b   : > { %1348 = vmatmul.mubr.bf16.gmra.mrb[36].mxu1 %v1102_v22 }
 0x16c   : > { %1357 = vmatprep.mubr.bf16.mxu1 %v1980_v2 }
 0x173   : > { %1358 = vmatmul.mubr.bf16.gmra.mrb[40].mxu1 %v1103_v14 }
 0x174   : > { %1367 = vmatprep.mubr.bf16.mxu1 %v1980_v2 }
 0x17b   : > { %1368 = vmatmul.mubr.bf16.gmra.mrb[44].mxu1 %v1104_v47 }
 0x216   : > { %v2504_v20 = vpop.f32.mrb[16].mxu1 }
 0x217   : > { %v2506_v49 = vpop.f32.mrb[17].mxu1  ;;  %v1873_v56 = vpop.f32.mrb[32].mxu0  ;;  %v1475_v38 = vrot.slane %v2504_v20, 7 }
 0x218   : > { %v1303_v33 = vpop.f32.mrb[18].mxu1  ;;  %v2508_v13 = vpop.f32.mrb[33].mxu0  ;;  %v1541_v22 = vrot.slane %v1873_v56, 1 }
 0x219   : > { %v1476_v53 = vrot.slane %v1303_v33, 7  ;;  %v1305_v48 = vpop.f32.mrb[19].mxu1  ;;  %v1874_v43 = vpop.f32.mrb[34].mxu0  ;;  %v1539_v30 = vrot.slane %v2508_v13, 1 }
 0x21a   : > { %v1542_v52 = vrot.slane %v1874_v43, 1  ;;  %v1415_v44 = vpop.f32.mrb[35].mxu0 }
 0x21b   : > { %v1505_v2 = vsel %vm944_vm1, %v1475_v38, %v1476_v53  ;;  %v1540_v54 = vrot.slane %v1415_v44, 1 }
 0x21c   : > { %v1524_v42 = vadd.f32 %v1505_v2, %v1305_v48  ;;  %v1567_v55 = vsel %vm1009_vm2, %v1541_v22, %v1542_v52 }
 0x21d   : > { %v1568_v57 = vsel %vm1009_vm2, %v1540_v54, %v1541_v22  ;;  %v2524_v59 = vsel %vm1009_vm2, %v1539_v30, %v1540_v54 }
 0x21e   : > { %v1572_v62 = vmul.f32 %v2238_v40, %v1568_v57  ;;  %v1309_v63 = vpop.f32.mrb[20].mxu1 }
 0x21f   : > { %v1477_v17 = vrot.slane %v1309_v63, 7  ;;  %v1311_v6 = vpop.f32.mrb[21].mxu1  ;;  %v1877_v5 = vpop.f32.mrb[36].mxu0 }
 0x220   : > { %v1588_v39 = vadd.f32 %v1572_v62, %v1524_v42  ;;  %v1313_v7 = vpop.f32.mrb[22].mxu1  ;;  %v1428_v14 = vpop.f32.mrb[37].mxu0  ;;  %v1545_v37 = vrot.slane %v1877_v5, 1 }
 0x221   : > { %v1504_v21 = vsel %vm944_vm1, %v1476_v53, %v1477_v17  ;;  %v1478_v15 = vrot.slane %v1313_v7, 7  ;;  %v1543_v26 = vrot.slane %v1428_v14, 1  ;;  %v1315_v60 = vpop.f32.mrb[23].mxu1  ;;  %v1878_v40 = vpop.f32.mrb[38].mxu0 }
 0x222   : > { %v1611_v16 = vadd.f32 %v2530_v3, %v1588_v39  ;;  %v1509_v32 = vmul.f32 %v2270_v58, %v1504_v21  ;;  %v1546_v18 = vrot.slane %v1878_v40, 1  ;;  %v1431_v24 = vpop.f32.mrb[39].mxu0 }
 0x223   : > { %v1566_v45 = vsel %vm1009_vm2, %v1542_v52, %v1543_v26  ;;  %v1503_v23 = vsel %vm944_vm1, %v1477_v17, %v1478_v15  ;;  %v1544_v46 = vrot.slane %v1431_v24, 1 }
 0x224   : > { %v1627_v47 = vadd.f32 %v1611_v16, %v2084_v19  ;;  %v1525_v58 = vadd.f32 %v1509_v32, %v1311_v6  ;;  %v1526_v9 = vadd.f32 %v1503_v23, %v1315_v60  ;;  %v1574_v56 = vmul.f32 %v2275_v61, %v1566_v45 }
 0x225   : > { %v1564_v33 = vsel %vm1009_vm2, %v1544_v46, %v1545_v37  ;;  %v1565_v53 = vsel %vm1009_vm2, %v1543_v26, %v1544_v46  ;;  %v2555_v48 = vsel %vm1009_vm2, %v1545_v37, %v1546_v18 }
 0x226   : > { %1643 = vst [vmem:[%s2541_s16 + $0x8] sm:$0xff] %v1627_v47  ;;  %v1589_v43 = vadd.f32 %v1567_v55, %v1525_v58  ;;  %v1590_v22 = vadd.f32 %v1574_v56, %v1526_v9  ;;  %v1319_v52 = vpop.f32.mrb[24].mxu1  ;;  %v1576_v24 = vmul.f32 %v2305_v31, %v1564_v33 }
 0x227   : > { %v1479_v44 = vrot.slane %v1319_v52, 7  ;;  %v1321_v19 = vpop.f32.mrb[25].mxu1  ;;  %v1881_v2 = vpop.f32.mrb[40].mxu0 }
 0x228   : > { %v1612_v54 = vadd.f32 %v2530_v3, %v1589_v43  ;;  %v1613_v61 = vadd.f32 %v2530_v3, %v1590_v22  ;;  %v1323_v42 = vpop.f32.mrb[26].mxu1  ;;  %v1444_v57 = vpop.f32.mrb[41].mxu0  ;;  %v1549_v63 = vrot.slane %v1881_v2, 1  ;;  %v1962_v2 = vld [vmem:[%s2074_s6 + $0x28] sm:$0xff] }
 0x229   : > { %v1502_v62 = vsel %vm944_vm1, %v1478_v15, %v1479_v44  ;;  %v1480_v17 = vrot.slane %v1323_v42, 7  ;;  %v1547_v6 = vrot.slane %v1444_v57, 1  ;;  %v1325_v55 = vpop.f32.mrb[27].mxu1  ;;  %v1882_v5 = vpop.f32.mrb[42].mxu0 }
 0x22a   : > { %v1628_v39 = vadd.f32 %v1612_v54, %v2109_v28  ;;  %v1629_v7 = vadd.f32 %v1613_v61, %v2112_v29  ;;  %v1511_v14 = vmul.f32 %v2315_v41, %v1502_v62  ;;  %v1550_v21 = vrot.slane %v1882_v5, 1  ;;  %v1447_v26 = vpop.f32.mrb[43].mxu0 }
 0x22b   : > { %v1562_v60 = vsel %vm1009_vm2, %v1546_v18, %v1547_v6  ;;  %v1501_v40 = vsel %vm944_vm1, %v1479_v44, %v1480_v17  ;;  %v1548_v15 = vrot.slane %v1447_v26, 1  ;;  %v1961_v44 = vld [vmem:[%s2074_s6 + $0x20] sm:$0xff] }
 0x22c   : > { %1644 = vst [vmem:[%s2541_s16 + $0x10] sm:$0xff] %v1628_v39  ;;  %1645 = vst [vmem:[%s2541_s16 + $0x18] sm:$0xff] %v1629_v7  ;;  %v1527_v16 = vadd.f32 %v1511_v14, %v1321_v19  ;;  %v1528_v32 = vadd.f32 %v1501_v40, %v1325_v55  ;;  %v2574_v28 = vsel %vm1009_vm2, %v1549_v63, %v1550_v21 }
 0x22d   : > { %v1560_v29 = vsel %vm1009_vm2, %v1548_v15, %v1549_v63  ;;  %v1561_v41 = vsel %vm1009_vm2, %v1547_v6, %v1548_v15  ;;  %v1578_v39 = vmul.f32 %v2356_v27, %v1562_v60 }
 0x22e   : > { %v1591_v18 = vadd.f32 %v1565_v53, %v1527_v16  ;;  %v1592_v37 = vadd.f32 %v1576_v24, %v1528_v32  ;;  %v1329_v45 = vpop.f32.mrb[28].mxu1 }
 0x22f   : > { %v1481_v23 = vrot.slane %v1329_v45, 7  ;;  %v1331_v46 = vpop.f32.mrb[29].mxu1  ;;  %v1885_v47 = vpop.f32.mrb[44].mxu0 }
 0x230   : > { %v1614_v31 = vadd.f32 %v2530_v3, %v1591_v18  ;;  %v1615_v58 = vadd.f32 %v2530_v3, %v1592_v37  ;;  %v1333_v9 = vpop.f32.mrb[30].mxu1  ;;  %v1460_v56 = vpop.f32.mrb[45].mxu0  ;;  %v1553_v62 = vrot.slane %v1885_v47, 1 }
 0x231   : > { %v1500_v33 = vsel %vm944_vm1, %v1480_v17, %v1481_v23  ;;  %v1482_v43 = vrot.slane %v1333_v9, 7  ;;  %v1551_v22 = vrot.slane %v1460_v56, 1  ;;  %v1335_v53 = vpop.f32.mrb[31].mxu1  ;;  %v1886_v52 = vpop.f32.mrb[46].mxu0 }
 0x232   : > { %v1630_v19 = vadd.f32 %v1961_v44, %v1614_v31  ;;  %v1631_v54 = vadd.f32 %v1962_v2, %v1615_v58  ;;  %v1513_v61 = vmul.f32 %v2351_v25, %v1500_v33  ;;  %v1554_v42 = vrot.slane %v1886_v52, 1  ;;  %v1463_v57 = vpop.f32.mrb[47].mxu0  ;;  %v1963_v44 = vld [vmem:[%s2074_s6 + $0x40] sm:$0xff] }
 0x233   : > { %v1558_v63 = vsel %vm1009_vm2, %v1550_v21, %v1551_v22  ;;  %v1499_v17 = vsel %vm944_vm1, %v1481_v23, %v1482_v43  ;;  %v1552_v6 = vrot.slane %v1463_v57, 1  ;;  %v1580_v31 = vmul.f32 %v2405_v36, %v1560_v29  ;;  %v1964_v36 = vld [vmem:[%s2074_s6 + $0x48] sm:$0xff] }
 0x234   : > { %1646 = vst [vmem:[%s2541_s16 + $0x20] sm:$0xff] %v1630_v19  ;;  %1647 = vst [vmem:[%s2541_s16 + $0x28] sm:$0xff] %v1631_v54  ;;  %v1529_v55 = vadd.f32 %v1513_v61, %v1331_v46  ;;  %v1530_v5 = vadd.f32 %v1499_v17, %v1335_v53  ;;  %v2598_v25 = vsel %vm1009_vm2, %v1554_v42, %v1539_v30 }
 0x235   : > { %v2602_v7 = vsel %vm1009_vm2, %v1552_v6, %v1553_v62  ;;  %v2606_v14 = vsel %vm1009_vm2, %v1551_v22, %v1552_v6  ;;  %v2610_v21 = vsel %vm1009_vm2, %v1553_v62, %v1554_v42  ;;  %v1582_v42 = vmul.f32 %v2426_v10, %v1558_v63  ;;  %v1966_v63 = vld [vmem:[%s2074_s6 + $0x58] sm:$0xff] }
 0x236   : > { %v1593_v27 = vadd.f32 %v2555_v48, %v1529_v55  ;;  %v1594_v13 = vadd.f32 %v1578_v39, %v1530_v5  ;;  %v1339_v26 = vpop.f32.mrb[32].mxu1 }
 0x237   : > { %v1483_v30 = vrot.slane %v1339_v26, 7  ;;  %v1341_v60 = vpop.f32.mrb[33].mxu1 }
 0x238   : > { %v1616_v40 = vadd.f32 %v2530_v3, %v1593_v27  ;;  %v1617_v15 = vadd.f32 %v2530_v3, %v1594_v13  ;;  %v1343_v16 = vpop.f32.mrb[34].mxu1 }
 0x239   : > { %v1498_v32 = vsel %vm944_vm1, %v1482_v43, %v1483_v30  ;;  %v1484_v24 = vrot.slane %v1343_v16, 7  ;;  %v1345_v18 = vpop.f32.mrb[35].mxu1 }
 0x23a   : > { %v1632_v37 = vadd.f32 %v1616_v40, %v2120_v34  ;;  %v1633_v45 = vadd.f32 %v1617_v15, %v2123_v35  ;;  %v1515_v48 = vmul.f32 %v2400_v8, %v1498_v32  ;;  %v1584_v32 = vmul.f32 %v2445_v51, %v2602_v7  ;;  %v1968_v7 = vld [vmem:[%s2074_s6 + $0x68] sm:$0xff] }
 0x23b   : > { %v1497_v23 = vsel %vm944_vm1, %v1483_v30, %v1484_v24  ;;  %v1965_v30 = vld [vmem:[%s2074_s6 + $0x50] sm:$0xff] }
 0x23c   : > { %1648 = vst [vmem:[%s2541_s16 + $0x30] sm:$0xff] %v1632_v37  ;;  %1649 = vst [vmem:[%s2541_s16 + $0x38] sm:$0xff] %v1633_v45  ;;  %v1531_v46 = vadd.f32 %v1515_v48, %v1341_v60  ;;  %v1532_v47 = vadd.f32 %v1497_v23, %v1345_v18 }
 0x23e   : > { %v1595_v58 = vadd.f32 %v1561_v41, %v1531_v46  ;;  %v1596_v9 = vadd.f32 %v1580_v31, %v1532_v47  ;;  %v1349_v56 = vpop.f32.mrb[36].mxu1 }
 0x23f   : > { %v1485_v34 = vrot.slane %v1349_v56, 7  ;;  %v1351_v35 = vpop.f32.mrb[37].mxu1 }
 0x240   : > { %v1618_v8 = vadd.f32 %v2530_v3, %v1595_v58  ;;  %v1619_v33 = vadd.f32 %v2530_v3, %v1596_v9  ;;  %v1353_v43 = vpop.f32.mrb[38].mxu1  ;;  %v1967_v9 = vld [vmem:[%s2074_s6 + $0x60] sm:$0xff] }
 0x241   : > { %v1496_v22 = vsel %vm944_vm1, %v1484_v24, %v1485_v34  ;;  %v1486_v53 = vrot.slane %v1353_v43, 7  ;;  %v1355_v52 = vpop.f32.mrb[39].mxu1 }
 0x242   : > { %v1634_v19 = vadd.f32 %v1963_v44, %v1618_v8  ;;  %v1635_v29 = vadd.f32 %v1964_v36, %v1619_v33  ;;  %v1517_v41 = vmul.f32 %v2423_v4, %v1496_v22  ;;  %v1969_v44 = vld [vmem:[%s2074_s6 + $0x70] sm:$0xff]  ;;  %v1970_v36 = vld [vmem:[%s2074_s6 + $0x78] sm:$0xff] }
 0x243   : > { %v1495_v2 = vsel %vm944_vm1, %v1485_v34, %v1486_v53 }
 0x244   : > { %1650 = vst [vmem:[%s2541_s16 + $0x40] sm:$0xff] %v1634_v19  ;;  %1651 = vst [vmem:[%s2541_s16 + $0x48] sm:$0xff] %v1635_v29  ;;  %v1533_v54 = vadd.f32 %v1517_v41, %v1351_v35  ;;  %v1534_v61 = vadd.f32 %v1495_v2, %v1355_v52 }
 0x246   : > { %v1597_v57 = vadd.f32 %v2574_v28, %v1533_v54  ;;  %v1598_v62 = vadd.f32 %v1582_v42, %v1534_v61  ;;  %v1359_v17 = vpop.f32.mrb[40].mxu1 }
 0x247   : > { %v1487_v6 = vrot.slane %v1359_v17, 7  ;;  %v1361_v55 = vpop.f32.mrb[41].mxu1 }
 0x248   : > { %v1620_v4 = vadd.f32 %v2530_v3, %v1597_v57  ;;  %v1621_v5 = vadd.f32 %v2530_v3, %v1598_v62  ;;  %v1363_v39 = vpop.f32.mrb[42].mxu1 }
 0x249   : > { %v1494_v27 = vsel %vm944_vm1, %v1486_v53, %v1487_v6  ;;  %v1488_v13 = vrot.slane %v1363_v39, 7  ;;  %v1365_v26 = vpop.f32.mrb[43].mxu1 }
 0x24a   : > { %v1636_v10 = vadd.f32 %v1965_v30, %v1620_v4  ;;  %v1637_v28 = vadd.f32 %v1966_v63, %v1621_v5  ;;  %v1519_v60 = vmul.f32 %v2442_v1, %v1494_v27 }
 0x24b   : > { %v1493_v40 = vsel %vm944_vm1, %v1487_v6, %v1488_v13 }
 0x24c   : > { %1652 = vst [vmem:[%s2541_s16 + $0x50] sm:$0xff] %v1636_v10  ;;  %1653 = vst [vmem:[%s2541_s16 + $0x58] sm:$0xff] %v1637_v28  ;;  %v1535_v15 = vadd.f32 %v1519_v60, %v1361_v55  ;;  %v1536_v16 = vadd.f32 %v1493_v40, %v1365_v26 }
 0x24e   : > { %v1599_v24 = vadd.f32 %v2606_v14, %v1535_v15  ;;  %v1600_v18 = vadd.f32 %v1584_v32, %v1536_v16  ;;  %v1369_v37 = vpop.f32.mrb[44].mxu1 }
 0x24f   : > { %v1489_v45 = vrot.slane %v1369_v37, 7  ;;  %v1371_v1 = vpop.f32.mrb[45].mxu1 }
 0x250   : > { %v1622_v48 = vadd.f32 %v2530_v3, %v1599_v24  ;;  %v1623_v23 = vadd.f32 %v2530_v3, %v1600_v18  ;;  %v1373_v46 = vpop.f32.mrb[46].mxu1 }
 0x251   : > { %v1492_v47 = vsel %vm944_vm1, %v1488_v13, %v1489_v45  ;;  %v1490_v31 = vrot.slane %v1373_v46, 7  ;;  %v1375_v58 = vpop.f32.mrb[47].mxu1 }
 0x252   : > { %v1638_v51 = vadd.f32 %v1967_v9, %v1622_v48  ;;  %v1639_v14 = vadd.f32 %v1968_v7, %v1623_v23  ;;  %v1521_v56 = vmul.f32 %v2459_v50, %v1492_v47  ;;  %v1586_v50 = vmul.f32 %v2462_v0, %v2598_v25  ;;  %v1971_v0 = vld [vmem:[%s2074_s6] sm:$0xff] }
 0x253   : > { %v1506_v34 = vsel %vm944_vm1, %v1490_v31, %v1475_v38  ;;  %v1491_v35 = vsel %vm944_vm1, %v1489_v45, %v1490_v31 }
 0x254   : > { %1654 = vst [vmem:[%s2541_s16 + $0x60] sm:$0xff] %v1638_v51  ;;  %1655 = vst [vmem:[%s2541_s16 + $0x68] sm:$0xff] %v1639_v14  ;;  %v1537_v8 = vadd.f32 %v1521_v56, %v1371_v1  ;;  %v1507_v33 = vmul.f32 %v2469_v12, %v1506_v34  ;;  %v1538_v43 = vadd.f32 %v1491_v35, %v1375_v58 }
 0x256   : > { %v1601_v20 = vadd.f32 %v2610_v21, %v1537_v8  ;;  %v1523_v38 = vadd.f32 %v1507_v33, %v2506_v49  ;;  %v1602_v11 = vadd.f32 %v1586_v50, %v1538_v43 }
 0x258   : > { %v1624_v22 = vadd.f32 %v2530_v3, %v1601_v20  ;;  %v1587_v53 = vadd.f32 %v2524_v59, %v1523_v38  ;;  %v1625_v52 = vadd.f32 %v2530_v3, %v1602_v11 }
 0x25a   : > { %v1640_v19 = vadd.f32 %v1969_v44, %v1624_v22  ;;  %v1610_v12 = vadd.f32 %v2530_v3, %v1587_v53  ;;  %v1641_v29 = vadd.f32 %v1970_v36, %v1625_v52 }
 0x25c   : > { %1656 = vst [vmem:[%s2541_s16 + $0x70] sm:$0xff] %v1640_v19  ;;  %v1626_v25 = vadd.f32 %v1971_v0, %v1610_v12  ;;  %1657 = vst [vmem:[%s2541_s16 + $0x78] sm:$0xff] %v1641_v29 }
 0x25e   : > { %1642 = vst [vmem:[%s2541_s16] sm:$0xff] %v1626_v25 }
 0x25f PF: > { %s15_s18 = sadd.s32 1, %s1978_s18  }
 0x260   : > { %p12_p4 = scmp.ge.s32.totalorder %s15_s18, 4  }
 0x262   :  { %14 = sbr.rel (!%p12_p4) target bundleno = 1 (0x1), region = 70 }

</bundles_post_ra>
